<compile_context>
chip_gen: v7x
topology: tpu7x:2x2x1
jax: 0.10.0
libtpu: 0.0.40
codegen_flags: <defaults>
</compile_context>

<pallas_src>
import functools

import jax
import jax.numpy as jnp
from jax.experimental import pallas as pl
from jax.experimental.pallas import tpu as pltpu

INPUT_DIM = 13    # len(feature_cols) = 12 base + Manufacturer_encoded
HIDDEN_DIM = 32
OUTPUT_DIM = 13   # output_dim = len(feature_cols)


def mlp_kernel(x_ref, w1_ref, b1_ref, w2_ref, b2_ref, out_ref):
    # x_ref : (TB, IN)  f32  (natural row-major layout, streamed)
    # w1_ref: (HID, IN) bf16 (VMEM-resident)     b1_ref: (HID, 1) f32
    # w2_ref: (OUT, HID) bf16 (VMEM-resident)    b2_ref: (OUT, 1) f32
    # out_ref: (OUT, TB) f32  (lane-dense: batch on the lane axis)
    xb = x_ref[...].astype(jnp.bfloat16)          # cheap VPU cast, keeps MXU in bf16 mode

    # fc1: contract the IN axis of both operands -> (HID, TB).  Batch lands on
    # lanes so the MXU streams full 128-lane result blocks; Mosaic handles the
    # (TB, IN) -> (IN, TB) granule shuffle internally (XLU slot, hidden under DMA).
    h = jax.lax.dot_general(
        w1_ref[...], xb,
        dimension_numbers=(((1,), (1,)), ((), ())),
        preferred_element_type=jnp.float32)
    h = jnp.maximum(h + b1_ref[...], 0.0)          # f32 bias add + ReLU (VPU)

    # fc2 in native bf16 MXU mode, f32 accumulation.
    y = jnp.dot(w2_ref[...], h.astype(jnp.bfloat16),
                preferred_element_type=jnp.float32)
    out_ref[...] = (y + b2_ref[...]).astype(out_ref.dtype)


def mlp_feature_extractor(x, w1, b1, w2, b2, *,
                          block_batch=16384, min_pallas_batch=4096):
    """Pallas implementation of relu(x @ w1 + b1) @ w2 + b2.

    x: (B, INPUT_DIM) f32, w1: (IN, HID), b1: (HID,), w2: (HID, OUT), b2: (OUT,).
    Returns (B, OUTPUT_DIM) f32 (bf16 weights/activations on the MXU, f32 accumulation).
    """
    B = x.shape[0]
    assert x.shape[1] == INPUT_DIM

    # Tiny batches: XLA's fused matmul beats kernel launch + layout plumbing.
    if B < min_pallas_batch:
        return jnp.maximum(x @ w1 + b1[None, :], 0.0) @ w2 + b2[None, :]

    # Batch tile: as large as possible to amortize ~0.35 us/step grid overhead,
    # but capped at ceil(B/2) (rounded up to 128 lanes) so the grid keeps >= 2
    # steps and v7x can shard it over both TensorCores.  At TB=16384 the
    # double-buffered VMEM footprint is ~18 MiB (x tile lane-pads 13->128),
    # comfortably inside the 32 MiB scoped budget on every generation.
    TB = min(int(block_batch), pl.cdiv(B, 2))
    TB = max(128, ((TB + 127) // 128) * 128)
    B_pad = TB * pl.cdiv(B, TB)

    # Only pad when the batch is ragged (no unconditional wrapper pass on x).
    x_in = x if B_pad == B else jnp.pad(x, ((0, B_pad - B), (0, 0)))

    # Weights/biases are tiny; one-time bf16 cast, VMEM-resident across steps.
    w1_t = w1.T.astype(jnp.bfloat16)                      # (HID, IN)
    w2_t = w2.T.astype(jnp.bfloat16)                      # (OUT, HID)
    b1_c = b1.reshape(HIDDEN_DIM, 1).astype(jnp.float32)  # (HID, 1)
    b2_c = b2.reshape(OUTPUT_DIM, 1).astype(jnp.float32)  # (OUT, 1)

    out_t = pl.pallas_call(
        mlp_kernel,
        out_shape=jax.ShapeDtypeStruct((OUTPUT_DIM, B_pad), jnp.float32),
        grid=(B_pad // TB,),
        in_specs=[
            # Streamed, double-buffered natural-layout batch tiles of x (f32).
            pl.BlockSpec((TB, INPUT_DIM), lambda i: (i, 0)),
            # Weights / biases: same block every step -> stay VMEM-resident.
            pl.BlockSpec((HIDDEN_DIM, INPUT_DIM), lambda i: (0, 0)),
            pl.BlockSpec((HIDDEN_DIM, 1), lambda i: (0, 0)),
            pl.BlockSpec((OUTPUT_DIM, HIDDEN_DIM), lambda i: (0, 0)),
            pl.BlockSpec((OUTPUT_DIM, 1), lambda i: (0, 0)),
        ],
        # Lane-dense output tile (batch on lanes) -> unmasked vst path.
        out_specs=pl.BlockSpec((OUTPUT_DIM, TB), lambda i: (0, i)),
        compiler_params=pltpu.CompilerParams(
            dimension_semantics=("parallel",),   # shard batch over v7x's 2 TCs
            vmem_limit_bytes=32 * 1024 * 1024,
        ),
    )(x_in, w1_t, b1_c, w2_t, b2_c)

    # Module contract is (B, OUTPUT_DIM): single transpose back, drop pad rows.
    return out_t.T[:B]


def init_params(key):
    """Deterministic init mimicking nn.Linear (uniform +/- 1/sqrt(fan_in))."""
    k1, k2, k3, k4 = jax.random.split(key, 4)
    bound1 = 1.0 / jnp.sqrt(INPUT_DIM)
    bound2 = 1.0 / jnp.sqrt(HIDDEN_DIM)
    w1 = jax.random.uniform(k1, (INPUT_DIM, HIDDEN_DIM), jnp.float32, -bound1, bound1)
    b1 = jax.random.uniform(k2, (HIDDEN_DIM,), jnp.float32, -bound1, bound1)
    w2 = jax.random.uniform(k3, (HIDDEN_DIM, OUTPUT_DIM), jnp.float32, -bound2, bound2)
    b2 = jax.random.uniform(k4, (OUTPUT_DIM,), jnp.float32, -bound2, bound2)
    return w1, b1, w2, b2


if __name__ == "__main__":
    key = jax.random.PRNGKey(0)
    kx, kp = jax.random.split(key)

    batch = 200   # small, non-multiple of 128: exercises padding + 2-step grid
    x = jax.random.normal(kx, (batch, INPUT_DIM), dtype=jnp.float32)
    w1, b1, w2, b2 = init_params(kp)

    # Force the Pallas path even at this small batch (bypass the XLA fallback).
    run = jax.jit(functools.partial(mlp_feature_extractor, min_pallas_batch=0))
    out = jax.block_until_ready(run(x, w1, b1, w2, b2))

    # Pure-JAX reference mirroring the kernel's bf16 rounding (f32 accumulation).
    xb = x.astype(jnp.bfloat16).astype(jnp.float32)
    w1b = w1.astype(jnp.bfloat16).astype(jnp.float32)
    w2b = w2.astype(jnp.bfloat16).astype(jnp.float32)
    h_ref = jnp.maximum(xb @ w1b + b1[None, :], 0.0)
    ref = h_ref.astype(jnp.bfloat16).astype(jnp.float32) @ w2b + b2[None, :]

    assert out.shape == (batch, OUTPUT_DIM)
    max_err = float(jnp.max(jnp.abs(out - ref)))
    assert jnp.allclose(out, ref, atol=2e-3, rtol=2e-3), max_err

    print("KERNEL_OK")
</pallas_src>

<mosaic_0001>
module attributes {stable_mosaic.version = 11 : i64} {
  func.func @mlp_kernel(%arg0: i32, %arg1: memref<128x13xf32, #tpu.memory_space<vmem>>, %arg2: memref<32x13xbf16, #tpu.memory_space<vmem>>, %arg3: memref<32x1xf32, #tpu.memory_space<vmem>>, %arg4: memref<13x32xbf16, #tpu.memory_space<vmem>>, %arg5: memref<13x1xf32, #tpu.memory_space<vmem>>, %arg6: memref<13x128xf32, #tpu.memory_space<vmem>>) attributes {dimension_semantics = [#tpu.dimension_semantics<parallel>], iteration_bounds = array<i64: 2>, scalar_prefetch = 0 : i64, scratch_operands = 0 : i64, tpu.core_type = #tpu.core_type<tc>, window_params = [{transform_indices = @transform_0, window_bounds = array<i64: 128, 13>}, {pipeline_mode = #tpu.pipeline_mode<synchronous>, transform_indices = @transform_1, window_bounds = array<i64: 32, 13>}, {pipeline_mode = #tpu.pipeline_mode<synchronous>, transform_indices = @transform_2, window_bounds = array<i64: 32, 1>}, {pipeline_mode = #tpu.pipeline_mode<synchronous>, transform_indices = @transform_3, window_bounds = array<i64: 13, 32>}, {pipeline_mode = #tpu.pipeline_mode<synchronous>, transform_indices = @transform_4, window_bounds = array<i64: 13, 1>}, {transform_indices = @transform_5, window_bounds = array<i64: 13, 128>}]} {
    %c0 = arith.constant 0 : index
    %c0_0 = arith.constant 0 : index
    %0 = vector.load %arg1[%c0, %c0_0] : memref<128x13xf32, #tpu.memory_space<vmem>>, vector<128x13xf32>
    %1 = arith.truncf %0 : vector<128x13xf32> to vector<128x13xbf16>
    %c0_1 = arith.constant 0 : index
    %c0_2 = arith.constant 0 : index
    %2 = vector.load %arg2[%c0_1, %c0_2] : memref<32x13xbf16, #tpu.memory_space<vmem>>, vector<32x13xbf16>
    %cst = arith.constant dense<0.000000e+00> : vector<32x128xf32>
    %3 = tpu.matmul %2, %1, %cst {dimension_numbers = #tpu.dot_dimension_numbers<[1], [1], [0], [0], [0, 0, 1, 0], [], []>} : vector<32x13xbf16>, vector<128x13xbf16>, vector<32x128xf32> -> vector<32x128xf32>
    %c0_3 = arith.constant 0 : index
    %c0_4 = arith.constant 0 : index
    %4 = vector.load %arg3[%c0_3, %c0_4] : memref<32x1xf32, #tpu.memory_space<vmem>>, vector<32x1xf32>
    %5 = vector.broadcast %4 : vector<32x1xf32> to vector<32x128xf32>
    %6 = arith.addf %3, %5 : vector<32x128xf32>
    %cst_5 = arith.constant 0.000000e+00 : f32
    %7 = vector.broadcast %cst_5 : f32 to vector<32x128xf32>
    %8 = arith.maximumf %6, %7 : vector<32x128xf32>
    %c0_6 = arith.constant 0 : index
    %c0_7 = arith.constant 0 : index
    %9 = vector.load %arg4[%c0_6, %c0_7] : memref<13x32xbf16, #tpu.memory_space<vmem>>, vector<13x32xbf16>
    %10 = arith.truncf %8 : vector<32x128xf32> to vector<32x128xbf16>
    %cst_8 = arith.constant dense<0.000000e+00> : vector<13x128xf32>
    %11 = tpu.matmul %9, %10, %cst_8 {dimension_numbers = #tpu.dot_dimension_numbers<[1], [0], [0], [1], [0, 0, 1, 1], [], []>} : vector<13x32xbf16>, vector<32x128xbf16>, vector<13x128xf32> -> vector<13x128xf32>
    %c0_9 = arith.constant 0 : index
    %c0_10 = arith.constant 0 : index
    %12 = vector.load %arg5[%c0_9, %c0_10] : memref<13x1xf32, #tpu.memory_space<vmem>>, vector<13x1xf32>
    %13 = vector.broadcast %12 : vector<13x1xf32> to vector<13x128xf32>
    %14 = arith.addf %11, %13 : vector<13x128xf32>
    %c0_11 = arith.constant 0 : index
    %c0_12 = arith.constant 0 : index
    %15 = vector.load %arg6[%c0_11, %c0_12] : memref<13x128xf32, #tpu.memory_space<vmem>>, vector<13x128xf32>
    tpu.vector_store %arg6[%c0_11, %c0_12], %14 {strides = array<i32>} : memref<13x128xf32, #tpu.memory_space<vmem>>, vector<13x128xf32>,
    return
  }
  func.func @transform_0(%arg0: i32) -> (i32, i32) {
    %c0_i32 = arith.constant 0 : i32
    %c0_i32_0 = arith.constant 0 : i32
    return %arg0, %c0_i32 : i32, i32
  }
  func.func @transform_1(%arg0: i32) -> (i32, i32) {
    %c0_i32 = arith.constant 0 : i32
    %c0_i32_0 = arith.constant 0 : i32
    %c0_i32_1 = arith.constant 0 : i32
    return %c0_i32, %c0_i32_0 : i32, i32
  }
  func.func @transform_2(%arg0: i32) -> (i32, i32) {
    %c0_i32 = arith.constant 0 : i32
    %c0_i32_0 = arith.constant 0 : i32
    %c0_i32_1 = arith.constant 0 : i32
    return %c0_i32, %c0_i32_0 : i32, i32
  }
  func.func @transform_3(%arg0: i32) -> (i32, i32) {
    %c0_i32 = arith.constant 0 : i32
    %c0_i32_0 = arith.constant 0 : i32
    %c0_i32_1 = arith.constant 0 : i32
    return %c0_i32, %c0_i32_0 : i32, i32
  }
  func.func @transform_4(%arg0: i32) -> (i32, i32) {
    %c0_i32 = arith.constant 0 : i32
    %c0_i32_0 = arith.constant 0 : i32
    %c0_i32_1 = arith.constant 0 : i32
    return %c0_i32, %c0_i32_0 : i32, i32
  }
  func.func @transform_5(%arg0: i32) -> (i32, i32) {
    %c0_i32 = arith.constant 0 : i32
    %c0_i32_0 = arith.constant 0 : i32
    return %c0_i32, %arg0 : i32, i32
  }
}

</mosaic_0001>

<bundles_post_ra>
// kernel: mlp_feature_extractor.1
= control target key start
LH: loop header
LB: loop body
LE: loop exit
PB: predicated region body
PF: predicated region fallthrough
CT: control target
= control target key end

     0   :  { %10 = vsyncpa [#allocation3], 0  ;;  %s897_s0 = inlined_call_operand.vmem [shape: f32[256,13], index: 0, kind: input, shape index: {}]   ;;  %s898_s1 = inlined_call_operand.vmem [shape: bf16[32,13], index: 1, kind: input, shape index: {}]   ;;  %s899_s2 = inlined_call_operand.vmem [shape: f32[32,1], index: 2, kind: input, shape index: {}]   ;;  %s900_s3 = inlined_call_operand.vmem [shape: bf16[13,32], index: 3, kind: input, shape index: {}]   ;;  %s901_s4 = inlined_call_operand.vmem [shape: f32[13,1], index: 4, kind: input, shape index: {}]   ;;  %s902_s5 = inlined_call_operand.hbm [shape: f32[13,256], index: 5, kind: output, shape index: {}]  }
   0x1   :  { %12 = vsyncpa [#allocation3 + $0x1], 0  ;;  %s732_s18 = smov 0   ;;  %s734_s19 = smov 0  }
   0x2   :  { %s736_s20 = smov 0   ;;  %s738_s21 = smov 0  }
   0x3 LB: > { %s753_s22 = sadd.s32 4294967295, %s693_s21   ;;  %s515_s23 = sadd.s32 4294967294, %s693_s21   ;;  %s693_s21 = sphi %s738_s21, %s908_s21   ;;  %s689_s20 = sphi %s736_s20, %s907_s20   ;;  %s685_s19 = sphi %s734_s19, %s906_s19   ;;  %s681_s18 = sphi %s732_s18, %s905_s18  }
   0x4   : > { %s757_s24 = sadd.s32 1, %s693_s21   ;;  %s135_s25 = sadd.s32 1, %s689_s20 }
   0x5   : > { %s132_s26 = ssub.s32 %s693_s21, %s757_s24  ;;  %p145_p0 = scmp.ne.s32.totalorder %s689_s20, %s685_s19 }
   0x6   : > { %p133_p1 = scmp.eq.s32.totalorder %s132_s26, 0  ;;  %p146_p2 = scmp.eq.s32.totalorder %s753_s22, 1 }
   0x7   : > { %p151_p3 = scmp.ne.s32.totalorder %s685_s19, %s681_s18  ;;  %p152_p4 = scmp.eq.s32.totalorder %s515_s23, 1 }
   0x8   : > { %s768_s27 = scalar_select %p133_p1, %s689_s20, %s135_s25  }
   0x9   : > { %p770_p5 = por %p146_p2, %p145_p0  ;;  %p774_p6 = por %p152_p4, %p151_p3 }
   0xa   : > { %p518_p7 = scmp.ge.s32.totalorder %s693_s21, 1  ;;  %p191_p8 = scmp.lt.s32.totalorder %s693_s21, 3 }
   0xc   : > { %p192_p9 = pnand %p518_p7, %p191_p8 }
   0xd   : > { %s520_s30 = sshll.u32 (!%p192_p9), %s753_s22, 4  ;;  %v628_v0 = vld [vmem:[%s898_s1] sm:$0xff] (!%p192_p9)   ;;  %vm288_vm0 = vcmask (!%p192_p9), 105472   ;;  %v256_v2 = vld [vmem:[%s899_s2 + $0x10] sm:$0xff] (!%p192_p9)  ;;  %v695_v3 = vmov (!%p192_p9), 0   ;;  %v255_v4 = vld [vmem:[%s899_s2 + $0x8] sm:$0xff] (!%p192_p9) }
   0xe   : > { %195 = sbr.rel (%p192_p9) target bundleno = 551 (0x227), region = 40  ;;  %p220_p10 = scmp.lt.s32.totalorder (!%p192_p9), %s520_s30, 31  ;;  %v254_v1 = vld [vmem:[%s899_s2] sm:$0xff] (!%p192_p9)  ;;  %561 = vmatprep.mubr.msk.bf16.mxu0 (!%p192_p9), %vm288_vm0, %v628_v0  ;;  %626 = vset.pattern.permute.xlu0 (!%p192_p9), %v695_v3  ;;  %v257_v5 = vld [vmem:[%s899_s2 + $0x18] sm:$0xff] (!%p192_p9)  ;;  %v377_v14 = vld [vmem:[%s901_s4 + $0x8] sm:$0x1f] (!%p192_p9) }
   0xf   : > { %260 = vperm.xlu0 (!%p192_p9), %626, %v254_v1   ;;  %627 = vset.pattern.permute.xlu1 (!%p192_p9), %v695_v3  ;;  %v376_v12 = vld [vmem:[%s901_s4] sm:$0xff] (!%p192_p9)  ;;  %v629_v40 = vld [vmem:[%s898_s1 + $0x8] sm:$0xff] (!%p192_p9)   ;;  %v696_v41 = vmov (!%p192_p9), 0.0   ;;  %vm697_vm1 = vmmov (!%p192_p9), 0   ;;  %vm393_vm2 = vcmask (!%p192_p9), 261120   ;;  %s529_s16 = sshll.u32 (!%p192_p9), %s753_s22, 7 }
  0x10   : > { %270 = vperm.xlu1 (!%p192_p9), %627, %v256_v2   ;;  %565 = vmatprep.subr.bf16.mxu1 (!%p192_p9), %v696_v41  ;;  %v630_v60 = vld [vmem:[%s900_s3] sm:$0x7f] (!%p192_p9)   ;;  %s854_s25 = scalar_lea.hbm (!%p192_p9), %s902_s5, %s529_s16 }
  0x11   : > { %569 = vmatprep.mubr.msk.bf16.mxu1 (!%p192_p9), %vm697_vm1, %v696_v41 }
  0x13   : > { %265 = vperm.xlu0 (!%p192_p9), %626, %v255_v4  }
  0x14   : > { %275 = vperm.xlu1 (!%p192_p9), %627, %v257_v5  }
  0x15   : > { %s910_s30 = smov (!%p220_p10, %s520_s30), 31 }
  0x16   : > { %s521_s12 = sshll.u32 %s910_s30, 3  ;;  %s698_s30 = smov [#allocation2]  }
  0x17   : > { %s797_s17 = scalar_lea.vmem %s897_s0, %s521_s12  ;;  %380 = vperm.xlu0 %626, %v376_v12   ;;  %s216_s12 = sand.u32 1, %s685_s19  }
  0x18   : > { %v226_v6 = vld [vmem:[%s797_s17] sm:$0xff]  ;;  %v227_v7 = vld [vmem:[%s797_s17 + $0x8] sm:$0xff]  ;;  %v228_v8 = vld [vmem:[%s797_s17 + $0x10] sm:$0xff]  ;;  %385 = vperm.xlu1 %627, %v377_v14   ;;  %s519_s13 = sshll.u32 %s216_s12, 4  ;;  %s856_s22 = scalar_lea.sflag [#allocation3], %s216_s12 }
  0x19   : > { %v242_v9 = vpack.c.bf16 %v227_v7, %v226_v6  ;;  %v229_v10 = vld [vmem:[%s797_s17 + $0x18] sm:$0xff]  ;;  %v230_v15 = vld [vmem:[%s797_s17 + $0x20] sm:$0xff]  ;;  %v231_v16 = vld [vmem:[%s797_s17 + $0x28] sm:$0xff]  ;;  %s218_s14 = scalar_lea.vmem [#allocation2], %s519_s13  ;;  %s635_s6 = sshll.u32 %s698_s30, 4  ;;  %s636_s6 = int_to_ptr.vmem [resolvable:$false] %s635_s6 }
  0x1a   : > { %v243_v11 = vpack.c.bf16 %v229_v10, %v228_v8  ;;  %v244_v18 = vpack.c.bf16 %v231_v16, %v230_v15  ;;  %v232_v19 = vld [vmem:[%s797_s17 + $0x30] sm:$0xff]  ;;  %v233_v20 = vld [vmem:[%s797_s17 + $0x38] sm:$0xff]  ;;  %v234_v23 = vld [vmem:[%s797_s17 + $0x40] sm:$0xff]  ;;  %s453_s15 = sshll.u32 %s218_s14, 4  ;;  %s637_s7 = scalar_lea.vmem %s636_s6, 512  ;;  %s849_s15 = int_to_ptr.vmem [resolvable:$true] %s453_s15 }
  0x1b   : > { %573 = vmatprep.subr.msk.bf16.mxu0 %vm288_vm0, %v242_v9  ;;  %v296_v13 = vsel %vm288_vm0, %v242_v9, 0  ;;  %v245_v22 = vpack.c.bf16 %v233_v20, %v232_v19  ;;  %v235_v24 = vld [vmem:[%s797_s17 + $0x48] sm:$0xff]  ;;  %v236_v27 = vld [vmem:[%s797_s17 + $0x50] sm:$0xff]  ;;  %v237_v28 = vld [vmem:[%s797_s17 + $0x58] sm:$0xff]  ;;  %s631_s26 = scalar_lea.vmem %s849_s15, 256  ;;  %p638_p0 = scmp.lt.s32.totalorder %s849_s15, %s636_s6 }
  0x1c   : > { %546 = vmatpush3.bf16.xpose.msra.mxu0 %v296_v13  ;;  %v299_v17 = vsel %vm288_vm0, %v243_v11, 0  ;;  %v302_v21 = vsel %vm288_vm0, %v244_v18, 0  ;;  %v246_v26 = vpack.c.bf16 %v235_v24, %v234_v23  ;;  %v247_v30 = vpack.c.bf16 %v237_v28, %v236_v27  ;;  %v238_v31 = vld [vmem:[%s797_s17 + $0x60] sm:$0xff]  ;;  %v239_v32 = vld [vmem:[%s797_s17 + $0x68] sm:$0xff]  ;;  %v240_v35 = vld [vmem:[%s797_s17 + $0x70] sm:$0xff]  ;;  %p632_p11 = scmp.ne.s32.totalorder %s849_s15, %s631_s26  ;;  %p639_p1 = scmp.lt.s32.totalorder %s637_s7, %s631_s26 }
  0x1d   : > { %574 = vmatprep.subr.msk.bf16.mxu0 %vm288_vm0, %v243_v11  ;;  %v305_v25 = vsel %vm288_vm0, %v245_v22, 0  ;;  %v248_v34 = vpack.c.bf16 %v239_v32, %v238_v31  ;;  %v241_v36 = vld [vmem:[%s797_s17 + $0x78] sm:$0xff] }
  0x1e   : > { %v308_v29 = vsel %vm288_vm0, %v246_v26, 0  ;;  %v311_v33 = vsel %vm288_vm0, %v247_v30, 0  ;;  %v249_v38 = vpack.c.bf16 %v241_v36, %v240_v35  ;;  %p633_p12 = pnand %p632_p11, %p770_p5  ;;  %p640_p2 = por %p639_p1, %p638_p0 }
  0x1f   : > { %v314_v37 = vsel %vm288_vm0, %v248_v34, 0 }
  0x20   : > { %v317_v39 = vsel %vm288_vm0, %v249_v38, 0  ;;  %p634_p13 = pneg %p633_p12 }
  0x22   : > { %p641_p3 = pnand %p640_p2, %p634_p13 }
  0x24   : > { %548 = vmatpush3.bf16.xpose.msra.mxu0 %v299_v17 }
  0x25   : > { %575 = vmatprep.subr.msk.bf16.mxu0 %vm288_vm0, %v244_v18 }
  0x2c   : > { %550 = vmatpush3.bf16.xpose.msra.mxu0 %v302_v21 }
  0x2d   : > { %576 = vmatprep.subr.msk.bf16.mxu0 %vm288_vm0, %v245_v22 }
  0x34   : > { %552 = vmatpush3.bf16.xpose.msra.mxu0 %v305_v25 }
  0x35   : > { %577 = vmatprep.subr.msk.bf16.mxu0 %vm288_vm0, %v246_v26 }
  0x3c   : > { %554 = vmatpush3.bf16.xpose.msra.mxu0 %v308_v29 }
  0x3d   : > { %578 = vmatprep.subr.msk.bf16.mxu0 %vm288_vm0, %v247_v30 }
  0x44   : > { %556 = vmatpush3.bf16.xpose.msra.mxu0 %v311_v33 }
  0x45   : > { %579 = vmatprep.subr.msk.bf16.mxu0 %vm288_vm0, %v248_v34 }
  0x4c   : > { %558 = vmatpush3.bf16.xpose.msra.mxu0 %v314_v37 }
  0x4d   : > { %580 = vmatprep.subr.msk.bf16.mxu0 %vm288_vm0, %v249_v38 }
  0x54   : > { %560 = vmatpush3.bf16.xpose.msra.mxu0 %v317_v39 }
  0x5b   : > { %562 = vmatmul.mubr.msk.bf16.vlgmr.msra.gmra.mrb[0].mxu0 %vm288_vm0, %v629_v40 }
  0x8e   : > { %v261_v43 = vpop.permute.xlu0 %260 }
  0x8f   : > { %v271_v42 = vpop.permute.xlu1 %270 }
  0x92   : > { %v266_v50 = vpop.permute.xlu0 %265 }
  0x93   : > { %v276_v47 = vpop.permute.xlu1 %275 }
  0x96   : > { %v381_v61 = vpop.permute.xlu0 %380 }
  0x97   : > { %v386_v1 = vpop.permute.xlu1 %385 }
 0x12e   : > { %v563_v44 = vpop.f32.mrb[0].mxu0 }
 0x12f   : > { %v362_v45 = vadd.f32 %v563_v44, %v271_v42  ;;  %v353_v46 = vpop.f32.mrb[1].mxu0 }
 0x130   : > { %v354_v48 = vadd.f32 %v353_v46, %v261_v43  ;;  %v564_v49 = vpop.f32.mrb[2].mxu0 }
 0x131   : > { %v365_v51 = vadd.f32 %v564_v49, %v276_v47  ;;  %v356_v52 = vpop.f32.mrb[3].mxu0  ;;  %v370_v54 = vmax.f32 %v362_v45, 0.0 }
 0x132   : > { %v357_v53 = vadd.f32 %v356_v52, %v266_v50  ;;  %v368_v56 = vmax.f32 %v354_v48, 0.0 }
 0x133   : > { %v371_v55 = vmax.f32 %v365_v51, 0.0 }
 0x134   : > { %v369_v57 = vmax.f32 %v357_v53, 0.0 }
 0x135   : > { %v375_v58 = vpack.c.bf16 %v371_v55, %v370_v54 }
 0x136   : > { %v374_v59 = vpack.c.bf16 %v369_v57, %v368_v56 }
 0x138   : > { %566 = vmatpush3.bf16.msra.mxu1 %v374_v59 }
 0x139   : > { %567 = vmatprep.subr.bf16.mxu1 %v696_v41 }
 0x13c   : > { %568 = vmatpush3.bf16.msra.mxu1 %v375_v58 }
 0x13f   : > { %570 = vmatmul.mubr.msk.bf16.vlgmr.msra.gmra.mrb[0].mxu1 %vm393_vm2, %v630_v60 }
 0x212   : > { %v431_v62 = vpop.f32.mrb[0].mxu1 }
 0x213   : > { %v432_v63 = vadd.f32 %v431_v62, %v381_v61  ;;  %v571_v0 = vpop.f32.mrb[1].mxu1 }
 0x214   : > { %v434_v2 = vpop.f32.mrb[2].mxu1 }
 0x215   : > { %438 = vst [vmem:[%s218_s14] sm:$0xff] %v432_v63  ;;  %v435_v3 = vadd.f32 %v434_v2, %v386_v1  ;;  %v572_v4 = vpop.f32.mrb[3].mxu1 }
 0x217   : > { %439 = vst [vmem:[%s218_s14 + $0x8] sm:$0x1f] %v435_v3 }
 0x218   : > { %644 = shalt.err (!%p641_p3)
}
 0x219   : > { %s645_s8 = scalar_lea.hbm %s854_s25, 256  ;;  %s649_s11 = scalar_lea.hbm %s902_s5, 512 }
 0x21a   : > { %p646_p4 = scmp.ne.s32.totalorder %s854_s25, %s645_s8  ;;  %p650_p9 = scmp.lt.u32.totalorder %s854_s25, %s902_s5 }
 0x21b   : > { %p651_p10 = scmp.lt.u32.totalorder %s649_s11, %s645_s8  ;;  %p653_p12 = scmp.lt.u32.totalorder %s645_s8, %s854_s25 }
 0x21c   : > { %p647_p7 = pnand %p646_p4, %p770_p5 }
 0x21d   : > { %p652_p11 = por %p651_p10, %p650_p9 }
 0x21e   : > { %p648_p8 = pneg %p647_p7 }
 0x21f   : > { %p654_p13 = por %p653_p12, %p652_p11 }
 0x221   : > { %p655_p0 = pnand %p654_p13, %p648_p8 }
 0x223   : > { %658 = shalt.err (!%p655_p0)
}
 0x224   : > { %s699_s14 = smov 128   ;;  %s700_s16 = smov 256  }
 0x225   : > { %s701_s17 = smov 8  }
 0x226   : > { %581 = dma.vmem_to_hbm [thread:$0]  (%p770_p5), %s849_s15, 256, %s854_s25, %s856_s22, %s699_s14, %s700_s16, %s701_s17  }
 0x227 PF: > { %p587_p1 = scmp.ge.s32.totalorder %s693_s21, 2  ;;  %s468_s23 = sand.u32 1, %s681_s18  }
 0x228   : > { %s469_s26 = scalar_lea.sflag [#allocation3], %s468_s23 }
 0x229   : > { %p584_p2 = pnand %p587_p1, %p774_p6 }
 0x22b   : > { %676 = dma.done.wait (!%p584_p2), %s469_s26, 256  }
 0x22c   : > { %678 = vsyncadd (!%p584_p2), %s469_s26, 4294967040  ;;  %p15_p3 = scmp.ge.s32.totalorder %s757_s24, 4   ;;  %s905_s18 = smov %s685_s19 }
 0x22d   : > { %s906_s19 = smov %s689_s20  ;;  %s907_s20 = smov %s768_s27 }
 0x22e   : > { %s908_s21 = smov %s757_s24  ;;  %17 = sbr.rel (!%p15_p3) target bundleno = 3 (0x3), region = 75 }
 0x235   :  { %474 = vsyncpa [#allocation3], 1 }
 0x236   :  { %476 = vsyncpa [#allocation3 + $0x1], 1 }

</bundles_post_ra>
